<compile_context>
chip_gen: v6e
topology: v6e:2x2x1
jax: 0.10.0
libtpu: 0.0.40
codegen_flags: <defaults>
</compile_context>

<pallas_src>
import functools
import math

import jax
import jax.numpy as jnp
from jax import lax
from jax.experimental import pallas as pl
from jax.experimental.pallas import tpu as pltpu


# ---------------------------------------------------------------------------
# Fused tcn_layer kernel: temporal conv (kt,1) + bias + residual + activation
# ---------------------------------------------------------------------------
def _tcn_kernel(x_ref, w_ref, b_ref, o_ref, *, act, offsets, c_out, v):
    # x_ref : (c_in,  S)   with S = T*V   (batch dim squeezed by BlockSpec)
    # w_ref : (n_tap, c_filt, c_in)
    # b_ref : (c_filt, 1)
    # o_ref : (c_out, S)
    x = x_ref[...].astype(jnp.float32)                       # (c_in, S)
    c_in, s_len = x.shape

    def shift_time(a, off):
        # a'[:, t*V + j] = a[:, (t+off)*V + j], zero outside the valid range.
        if off == 0:
            return a
        lanes = abs(off) * v
        zeros = jnp.zeros((c_in, lanes), jnp.float32)
        if off > 0:
            return jnp.concatenate([a[:, lanes:], zeros], axis=1)
        return jnp.concatenate([zeros, a[:, : s_len - lanes]], axis=1)

    acc = jnp.dot(w_ref[0].astype(jnp.float32), shift_time(x, offsets[0]),
                  preferred_element_type=jnp.float32)
    for k in range(1, len(offsets)):
        acc = acc + jnp.dot(w_ref[k].astype(jnp.float32),
                            shift_time(x, offsets[k]),
                            preferred_element_type=jnp.float32)
    acc = acc + b_ref[...].astype(jnp.float32)       # (c_filt,1) lane-broadcast

    if act == "GLU":
        out = (acc[:c_out] + x) * jax.nn.sigmoid(acc[c_out:])
    elif act == "sigmoid":
        out = jax.nn.sigmoid(acc + x)
    else:  # 'linear'
        out = acc + x
    o_ref[...] = out.astype(o_ref.dtype)


@functools.partial(jax.jit, static_argnames=("act", "kt"))
def tcn_layer_forward(x, weight, bias, *, act="linear", kt=2):
    """tcn_layer.forward (inference mode: dropout == identity).

    x      : (N, c_in, T, V) float32, NCHW
    weight : (c_filt, c_in, kt, 1)  PyTorch Conv2d layout, c_filt = c_out*(2 if GLU else 1)
    bias   : (c_filt,)
    """
    N, c_in, T, V = x.shape
    c_filt = weight.shape[0]
    if act == "GLU":
        assert kt == 3 and weight.shape[2] == 3
        c_out = c_filt // 2
        offsets = (-1, 0, 1)            # y[t] = W0 x[t-1] + W1 x[t] + W2 x[t+1]
    elif act == "sigmoid":
        assert kt == 3 and weight.shape[2] == 3
        c_out = c_filt
        offsets = (-1, 0, 1)
    else:                               # 'linear': conv(x)[:, :, 1:, :] + x
        assert kt == 2 and weight.shape[2] == 2
        c_out = c_filt
        offsets = (0, 1)                # h[t] = W0 x[t] + W1 x[t+1] + x[t]
    assert c_in == c_out                # required by PyTorch's residual add

    S = T * V
    x2 = x.reshape(N, c_in, S)                            # free contiguous view
    w = jnp.transpose(weight[..., 0], (2, 0, 1))          # (kt, c_filt, c_in), tiny
    b = bias.reshape(c_filt, 1)

    kernel = functools.partial(_tcn_kernel, act=act, offsets=offsets,
                               c_out=c_out, v=V)
    n_tap = len(offsets)
    out = pl.pallas_call(
        kernel,
        out_shape=jax.ShapeDtypeStruct((N, c_out, S), x.dtype),
        grid_spec=pltpu.PrefetchScalarGridSpec(
            num_scalar_prefetch=0,
            grid=(N,),
            in_specs=[
                pl.BlockSpec((pl.Squeezed(), c_in, S), lambda n: (n, 0, 0)),
                pl.BlockSpec((n_tap, c_filt, c_in), lambda n: (0, 0, 0)),
                pl.BlockSpec((c_filt, 1), lambda n: (0, 0)),
            ],
            out_specs=pl.BlockSpec((pl.Squeezed(), c_out, S),
                                   lambda n: (n, 0, 0)),
        ),
        compiler_params=pltpu.CompilerParams(
            dimension_semantics=("parallel",),   # both TCs busy on v7x megacore
        ),
        cost_estimate=pl.CostEstimate(
            flops=2 * N * n_tap * c_filt * c_in * S,
            transcendentals=(N * c_out * S if act in ("GLU", "sigmoid") else 0),
            bytes_accessed=4 * N * S * (c_in + c_out),
        ),
    )(x2, w, b)
    # TODO(synk): training-mode F.dropout needs a PRNG; inference is identity.
    return out.reshape(N, c_out, T, V)


# ---------------------------------------------------------------------------
# align dependent class: 1x1 conv kernel, NCHW-direct + lane-dense blocks
# ---------------------------------------------------------------------------
def _align_conv1x1_kernel(x_ref, w_ref, b_ref, o_ref):
    # x_ref: (c_in, TILE_S)   w_ref: (c_out, c_in)   b_ref: (c_out, 1)
    acc = jnp.dot(w_ref[...], x_ref[...], preferred_element_type=jnp.float32)
    o_ref[...] = (acc + b_ref[...]).astype(o_ref.dtype)


def _pick_lane_tile(s, max_tile=4096):
    # Lane tile must be a multiple of 128 or the full extent; prefer large tiles.
    if s <= max_tile or s % 128 != 0:
        return s
    return max_tile


@functools.partial(jax.jit, static_argnames=("c_in", "c_out"))
def align_forward(x, params, *, c_in, c_out):
    """align.forward: NCHW (N, c_in, H, W) -> (N, c_out, H, W)."""
    N, C, H, W = x.shape
    assert C == c_in

    if c_in > c_out:
        S = H * W
        x2 = x.reshape(N, c_in, S)            # free view; stays NCHW, no transpose
        tile_s = _pick_lane_tile(S)
        grid = (N, pl.cdiv(S, tile_s))        # edge block masked by Pallas; no jnp.pad
        out = pl.pallas_call(
            _align_conv1x1_kernel,
            out_shape=jax.ShapeDtypeStruct((N, c_out, S), x.dtype),
            grid_spec=pltpu.PrefetchScalarGridSpec(
                num_scalar_prefetch=0,
                grid=grid,
                in_specs=[
                    pl.BlockSpec((pl.Squeezed(), c_in, tile_s),
                                 lambda n, s: (n, 0, s)),
                    pl.BlockSpec((c_out, c_in), lambda n, s: (0, 0)),
                    pl.BlockSpec((c_out, 1), lambda n, s: (0, 0)),
                ],
                out_specs=pl.BlockSpec((pl.Squeezed(), c_out, tile_s),
                                       lambda n, s: (n, 0, s)),
            ),
            compiler_params=pltpu.CompilerParams(
                dimension_semantics=("parallel", "parallel"),
            ),
            cost_estimate=pl.CostEstimate(
                flops=2 * N * S * c_in * c_out,
                transcendentals=0,
                bytes_accessed=4 * N * S * (c_in + c_out),
            ),
        )(x2, params["weight"], params["bias"].reshape(c_out, 1))
        return out.reshape(N, c_out, H, W)

    if c_in < c_out:
        # F.pad on trailing channels: pure data movement, plain JAX glue.
        return jnp.pad(x, ((0, 0), (0, c_out - c_in), (0, 0), (0, 0)))

    return x


# ---------------------------------------------------------------------------
# Parameter init (nn.Conv2d defaults: kaiming-uniform a=sqrt(5) -> 1/sqrt(fan_in))
# ---------------------------------------------------------------------------
def init_tcn_params(key, c_in, c_out, *, kt, act):
    c_filt = c_out * 2 if act == "GLU" else c_out
    kw_, kb_ = jax.random.split(key)
    bound = 1.0 / math.sqrt(c_in * kt)        # fan_in = c_in * kt * 1
    w = jax.random.uniform(kw_, (c_filt, c_in, kt, 1), jnp.float32, -bound, bound)
    b = jax.random.uniform(kb_, (c_filt,), jnp.float32, -bound, bound)
    return {"weight": w, "bias": b}


def init_align_params(key, c_in, c_out):
    if c_in <= c_out:
        return None                           # pad / identity branches: no params
    kw_, kb_ = jax.random.split(key)
    bound = 1.0 / math.sqrt(c_in)             # fan_in = c_in (1x1 kernel)
    # Stored directly in matmul layout (c_out, c_in); PyTorch keeps (c_out, c_in, 1, 1).
    w = jax.random.uniform(kw_, (c_out, c_in), jnp.float32, -bound, bound)
    b = jax.random.uniform(kb_, (c_out,), jnp.float32, -bound, bound)
    return {"weight": w, "bias": b}


# ---------------------------------------------------------------------------
if __name__ == "__main__":
    key = jax.random.PRNGKey(0)
    kx, kp_lin, kp_glu, kp_sig, kxa, kpa = jax.random.split(key, 6)

    # tcn_layer input: (batch, num_variables, num_timesteps, num_nodes)
    N, C, T, V = 2, 4, 16, 128
    x = jax.random.normal(kx, (N, C, T, V), jnp.float32)

    def conv_ref(x, w, b):  # PyTorch Conv2d(kernel=(kt,1), padding=(1,0)) reference
        y = lax.conv_general_dilated(
            x, w, window_strides=(1, 1), padding=((1, 1), (0, 0)),
            dimension_numbers=("NCHW", "OIHW", "NCHW"),
            precision=lax.Precision.HIGHEST)
        return y + b[None, :, None, None]

    # --- act='linear' (default), kt=2 ---------------------------------------
    p = init_tcn_params(kp_lin, C, C, kt=2, act="linear")
    y = tcn_layer_forward(x, p["weight"], p["bias"], act="linear", kt=2)
    jax.block_until_ready(y)
    ref = conv_ref(x, p["weight"], p["bias"])[:, :, 1:, :] + x
    assert y.shape == (N, C, T, V)
    assert jnp.allclose(y, ref, atol=1e-4, rtol=1e-4), float(jnp.abs(y - ref).max())

    # --- act='GLU', kt=3 ------------------------------------------------------
    p = init_tcn_params(kp_glu, C, C, kt=3, act="GLU")
    y = tcn_layer_forward(x, p["weight"], p["bias"], act="GLU", kt=3)
    jax.block_until_ready(y)
    yc = conv_ref(x, p["weight"], p["bias"])
    ref = (yc[:, :C] + x) * jax.nn.sigmoid(yc[:, C:])
    assert jnp.allclose(y, ref, atol=1e-4, rtol=1e-4), float(jnp.abs(y - ref).max())

    # --- act='sigmoid', kt=3 --------------------------------------------------
    p = init_tcn_params(kp_sig, C, C, kt=3, act="sigmoid")
    y = tcn_layer_forward(x, p["weight"], p["bias"], act="sigmoid", kt=3)
    jax.block_until_ready(y)
    ref = jax.nn.sigmoid(conv_ref(x, p["weight"], p["bias"]) + x)
    assert jnp.allclose(y, ref, atol=1e-4, rtol=1e-4), float(jnp.abs(y - ref).max())

    # --- align dependent class (1x1 conv / pad / identity branches) -----------
    ci, co, H, W_ = 8, 4, 16, 16
    xa = jax.random.normal(kxa, (N, ci, H, W_), jnp.float32)
    pa = init_align_params(kpa, ci, co)
    ya = align_forward(xa, pa, c_in=ci, c_out=co)
    jax.block_until_ready(ya)
    refa = (jnp.einsum("oc,nchw->nohw", pa["weight"], xa,
                       precision=lax.Precision.HIGHEST)
            + pa["bias"][None, :, None, None])
    assert jnp.allclose(ya, refa, atol=1e-4, rtol=1e-4)

    yb = align_forward(xa[:, :co], None, c_in=co, c_out=ci)      # pad branch
    assert yb.shape == (N, ci, H, W_)
    assert jnp.allclose(yb[:, :co], xa[:, :co]) and bool(jnp.all(yb[:, co:] == 0))
    yi = align_forward(xa, None, c_in=ci, c_out=ci)              # identity branch
    assert jnp.allclose(yi, xa)

    print("KERNEL_OK")
</pallas_src>

<mosaic_0001>
module attributes {stable_mosaic.version = 11 : i64} {
  func.func @_tcn_kernel(%arg0: i32, %arg1: memref<1x4x2048xf32, #tpu.memory_space<vmem>>, %arg2: memref<2x4x4xf32, #tpu.memory_space<vmem>>, %arg3: memref<4x1xf32, #tpu.memory_space<vmem>>, %arg4: memref<1x4x2048xf32, #tpu.memory_space<vmem>>) attributes {dimension_semantics = [#tpu.dimension_semantics<parallel>], iteration_bounds = array<i64: 2>, scalar_prefetch = 0 : i64, scratch_operands = 0 : i64, tpu.core_type = #tpu.core_type<tc>, window_params = [{transform_indices = @transform_0, window_bounds = array<i64: 1, 4, 2048>}, {pipeline_mode = #tpu.pipeline_mode<synchronous>, transform_indices = @transform_1, window_bounds = array<i64: 2, 4, 4>}, {pipeline_mode = #tpu.pipeline_mode<synchronous>, transform_indices = @transform_2, window_bounds = array<i64: 4, 1>}, {transform_indices = @transform_3, window_bounds = array<i64: 1, 4, 2048>}]} {
    %c0 = arith.constant 0 : index
    %c0_0 = arith.constant 0 : index
    %c0_1 = arith.constant 0 : index
    %0 = vector.load %arg1[%c0, %c0_0, %c0_1] : memref<1x4x2048xf32, #tpu.memory_space<vmem>>, vector<1x4x2048xf32>
    %1 = vector.shape_cast %0 : vector<1x4x2048xf32> to vector<4x2048xf32>
    %c0_2 = arith.constant 0 : index
    %c0_3 = arith.constant 0 : index
    %c0_4 = arith.constant 0 : index
    %2 = vector.load %arg2[%c0_2, %c0_3, %c0_4] : memref<2x4x4xf32, #tpu.memory_space<vmem>>, vector<1x4x4xf32>
    %3 = vector.shape_cast %2 : vector<1x4x4xf32> to vector<4x4xf32>
    %cst = arith.constant dense<0.000000e+00> : vector<4x2048xf32>
    %4 = tpu.matmul %3, %1, %cst {dimension_numbers = #tpu.dot_dimension_numbers<[1], [0], [0], [1], [0, 0, 1, 1], [], []>} : vector<4x4xf32>, vector<4x2048xf32>, vector<4x2048xf32> -> vector<4x2048xf32>
    %c1 = arith.constant 1 : index
    %c0_5 = arith.constant 0 : index
    %c0_6 = arith.constant 0 : index
    %5 = vector.load %arg2[%c1, %c0_5, %c0_6] : memref<2x4x4xf32, #tpu.memory_space<vmem>>, vector<1x4x4xf32>
    %6 = vector.shape_cast %5 : vector<1x4x4xf32> to vector<4x4xf32>
    %cst_7 = arith.constant 0.000000e+00 : f32
    %7 = vector.broadcast %cst_7 : f32 to vector<4x128xf32>
    %8 = vector.extract_strided_slice %1 {offsets = [0, 128], sizes = [4, 1920], strides = [1, 1]} : vector<4x2048xf32> to vector<4x1920xf32>
    %9 = tpu.concatenate %8, %7 in 1 : vector<4x1920xf32>, vector<4x128xf32> -> vector<4x2048xf32>
    %cst_8 = arith.constant dense<0.000000e+00> : vector<4x2048xf32>
    %10 = tpu.matmul %6, %9, %cst_8 {dimension_numbers = #tpu.dot_dimension_numbers<[1], [0], [0], [1], [0, 0, 1, 1], [], []>} : vector<4x4xf32>, vector<4x2048xf32>, vector<4x2048xf32> -> vector<4x2048xf32>
    %11 = arith.addf %4, %10 : vector<4x2048xf32>
    %c0_9 = arith.constant 0 : index
    %c0_10 = arith.constant 0 : index
    %12 = vector.load %arg3[%c0_9, %c0_10] : memref<4x1xf32, #tpu.memory_space<vmem>>, vector<4x1xf32>
    %13 = vector.broadcast %12 : vector<4x1xf32> to vector<4x2048xf32>
    %14 = arith.addf %11, %13 : vector<4x2048xf32>
    %15 = arith.addf %14, %1 : vector<4x2048xf32>
    %c0_11 = arith.constant 0 : index
    %c0_12 = arith.constant 0 : index
    %c0_13 = arith.constant 0 : index
    %16 = vector.load %arg4[%c0_11, %c0_12, %c0_13] : memref<1x4x2048xf32, #tpu.memory_space<vmem>>, vector<1x4x2048xf32>
    %17 = vector.shape_cast %16 : vector<1x4x2048xf32> to vector<4x2048xf32>
    %18 = vector.shape_cast %15 : vector<4x2048xf32> to vector<1x4x2048xf32>
    tpu.vector_store %arg4[%c0_11, %c0_12, %c0_13], %18 {strides = array<i32>} : memref<1x4x2048xf32, #tpu.memory_space<vmem>>, vector<1x4x2048xf32>,
    return
  }
  func.func @transform_0(%arg0: i32) -> (i32, i32, i32) {
    %c0_i32 = arith.constant 0 : i32
    %c0_i32_0 = arith.constant 0 : i32
    %c0_i32_1 = arith.constant 0 : i32
    return %arg0, %c0_i32, %c0_i32_0 : i32, i32, i32
  }
  func.func @transform_1(%arg0: i32) -> (i32, i32, i32) {
    %c0_i32 = arith.constant 0 : i32
    %c0_i32_0 = arith.constant 0 : i32
    %c0_i32_1 = arith.constant 0 : i32
    %c0_i32_2 = arith.constant 0 : i32
    return %c0_i32, %c0_i32_0, %c0_i32_1 : i32, i32, i32
  }
  func.func @transform_2(%arg0: i32) -> (i32, i32) {
    %c0_i32 = arith.constant 0 : i32
    %c0_i32_0 = arith.constant 0 : i32
    %c0_i32_1 = arith.constant 0 : i32
    return %c0_i32, %c0_i32_0 : i32, i32
  }
  func.func @transform_3(%arg0: i32) -> (i32, i32, i32) {
    %c0_i32 = arith.constant 0 : i32
    %c0_i32_0 = arith.constant 0 : i32
    %c0_i32_1 = arith.constant 0 : i32
    return %arg0, %c0_i32, %c0_i32_0 : i32, i32, i32
  }
}

</mosaic_0001>

<bundles_post_ra>
// kernel: tcn_layer_forward.1
= control target key start
LH: loop header
LB: loop body
LE: loop exit
PB: predicated region body
PF: predicated region fallthrough
CT: control target
= control target key end

     0   :  { %s1637_s12 = smov 0   ;;  %s1860_s0 = inlined_call_operand.vmem [shape: f32[2,4,2048], index: 0, kind: input, shape index: {}]   ;;  %s1861_s1 = inlined_call_operand.vmem [shape: f32[2,4,4], index: 1, kind: input, shape index: {}]   ;;  %s1862_s2 = inlined_call_operand.vmem [shape: f32[4,1], index: 2, kind: input, shape index: {}]   ;;  %s1863_s3 = inlined_call_operand.vmem [shape: f32[2,4,2048], index: 3, kind: output, shape index: {}]  }
   0x1 LB: > { %s1518_s13 = sadd.s32 4294967295, %s1612_s12   ;;  %p1522_p0 = scmp.ge.s32.totalorder %s1612_s12, 1  ;;  %s1612_s12 = sphi %s1637_s12, %s13_s12  }
   0x2   : > { %p137_p1 = scmp.lt.s32.totalorder %s1612_s12, 3 }
   0x4   : > { %p138_p2 = pnand %p1522_p0, %p137_p1 }
   0x5   : > { %p161_p3 = scmp.lt.s32.totalorder (!%p138_p2), %s1518_s13, 1 }
   0x6   : > { %141 = sbr.rel (%p138_p2) target bundleno = 250 (0xfa), region = 32 }
   0xb   : > { %v1614_v0 = vmov 0.0   ;;  %v1377_v1 = vld [vmem:[%s1862_s2] sm:$0xf]  ;;  %s1865_s13 = smov (!%p161_p3, %s1518_s13), 1  ;;  %v1615_v2 = vmov 0   ;;  %vm202_vm0 = vcmask 1043456  }
   0xc   : > { %300 = vmatprep.mubr.f32.mxu0 %v1614_v0  ;;  %371 = vmatprep.mubr.f32.mxu1 %v1614_v0  ;;  %s1577_s16 = sshll.u32 %s1865_s13, 6  ;;  %v1527_v8 = vld [vmem:[%s1861_s1 + $0x4] sm:$0xf]  ;;  %vm198_vm1 = vcmask 31744   ;;  %vm1616_vm2 = vmmov 0  }
   0xd   : > { %1597 = vset.pattern.permute.xlu0 %v1615_v2  ;;  %s165_s19 = scalar_lea.vmem %s1860_s0, %s1577_s16  ;;  %v179_v20 = vld [vmem:[%s1861_s1] sm:$0xf]  ;;  %s1822_s26 = scalar_lea.vmem %s1863_s3, %s1577_s16 }
   0xe   : > { %1380 = vperm.xlu0 %1597, %v1377_v1   ;;  %v1658_v3 = vld [vmem:[%s165_s19 + $0x8] sm:$0xff]  ;;  %v1660_v4 = vld [vmem:[%s165_s19 + $0x10] sm:$0xff]  ;;  %v1662_v5 = vld [vmem:[%s165_s19] sm:$0xff] }
   0xf   : > { %1528 = vmatprep.subr.msk.mxu0 %vm202_vm0, %v1658_v3  ;;  %1531 = vmatprep.subr.msk.mxu1 %vm202_vm0, %v1660_v4  ;;  %v1670_v6 = vcombine.high %v1662_v5, %v1662_v5  ;;  %v1674_v7 = vcombine.high %v1658_v3, %v1658_v3  ;;  %v1679_v9 = vld [vmem:[%s165_s19 + $0x18] sm:$0xff]  ;;  %v1683_v10 = vcombine.high %v1660_v4, %v1660_v4  ;;  %v1685_v11 = vld [vmem:[%s165_s19 + $0x20] sm:$0xff]  ;;  %v1697_v13 = vld [vmem:[%s165_s19 + $0x28] sm:$0xff] }
  0x10   : > { %v1693_v12 = vcombine.high %v1679_v9, %v1679_v9  ;;  %v1707_v14 = vcombine.high %v1685_v11, %v1685_v11  ;;  %v1710_v15 = vld [vmem:[%s165_s19 + $0x30] sm:$0xff]  ;;  %v1717_v16 = vcombine.high %v1697_v13, %v1697_v13  ;;  %v1721_v17 = vld [vmem:[%s165_s19 + $0x38] sm:$0xff] }
  0x11   : > { %1529 = vmatpush1.msk.msra.mxu0 %vm202_vm0, %v1670_v6  ;;  %1532 = vmatpush1.msk.msra.mxu1 %vm202_vm0, %v1674_v7  ;;  %v1731_v18 = vcombine.high %v1710_v15, %v1710_v15  ;;  %v1739_v19 = vcombine.high %v1721_v17, %v1721_v17 }
  0x12   : > { %1530 = vmatmul.mubr.msk.f32.vlgmr.msra.gmra.mxu0 %vm198_vm1, %v1527_v8  ;;  %1533 = vmatmul.mubr.msk.f32.vlgmr.msra.gmra.mxu1 %vm198_vm1, %v1527_v8 }
  0x13   : > { %1534 = vmatprep.subr.msk.mxu0 %vm202_vm0, %v1679_v9  ;;  %1537 = vmatprep.subr.msk.mxu1 %vm202_vm0, %v1685_v11 }
  0x14   : > { %1535 = vmatpush1.msk.msra.mxu0 %vm202_vm0, %v1683_v10  ;;  %442 = vmatprep.mubr.f32.mxu0 %v1614_v0 }
  0x15   : > { %1538 = vmatpush1.msk.msra.mxu1 %vm202_vm0, %v1693_v12  ;;  %513 = vmatprep.mubr.f32.mxu1 %v1614_v0 }
  0x16   : > { %1536 = vmatmul.mubr.msk.f32.vlgmr.msra.gmra.mxu0 %vm198_vm1, %v1527_v8  ;;  %1539 = vmatmul.mubr.msk.f32.vlgmr.msra.gmra.mxu1 %vm198_vm1, %v1527_v8 }
  0x17   : > { %1540 = vmatprep.subr.msk.mxu0 %vm202_vm0, %v1697_v13  ;;  %1543 = vmatprep.subr.msk.mxu1 %vm202_vm0, %v1710_v15 }
  0x18   : > { %1541 = vmatpush1.msk.msra.mxu0 %vm202_vm0, %v1707_v14  ;;  %584 = vmatprep.mubr.f32.mxu0 %v1614_v0 }
  0x19   : > { %1544 = vmatpush1.msk.msra.mxu1 %vm202_vm0, %v1717_v16  ;;  %655 = vmatprep.mubr.f32.mxu1 %v1614_v0 }
  0x1a   : > { %1542 = vmatmul.mubr.msk.f32.vlgmr.msra.gmra.mxu0 %vm198_vm1, %v1527_v8  ;;  %1545 = vmatmul.mubr.msk.f32.vlgmr.msra.gmra.mxu1 %vm198_vm1, %v1527_v8 }
  0x1b   : > { %1546 = vmatprep.subr.msk.mxu0 %vm202_vm0, %v1721_v17  ;;  %1581 = vmatprep.subr.mxu1 %v1614_v0 }
  0x1c   : > { %1547 = vmatpush1.msk.msra.mxu0 %vm202_vm0, %v1731_v18  ;;  %726 = vmatprep.mubr.f32.mxu0 %v1614_v0 }
  0x1d   : > { %1582 = vmatpush3.msk.msra.mxu1 %vm202_vm0, %v1739_v19  ;;  %1583 = vmatprep.mubr.msk.f32.mxu1 %vm1616_vm2, %v1614_v0 }
  0x1e   : > { %1548 = vmatmul.mubr.msk.f32.vlgmr.msra.gmra.mxu0 %vm198_vm1, %v1527_v8  ;;  %1584 = vmatmul.mubr.msk.f32.vlgmr.msra.gmra.mxu1 %vm198_vm1, %v1527_v8 }
  0x1f   : > { %1551 = vmatprep.subr.msk.mxu0 %vm202_vm0, %v1670_v6  ;;  %1554 = vmatprep.subr.msk.mxu1 %vm202_vm0, %v1674_v7 }
  0x20   : > { %1552 = vmatpush1.msk.msra.mxu0 %vm202_vm0, %v1662_v5  ;;  %873 = vmatprep.mubr.f32.mxu0 %v1614_v0 }
  0x21   : > { %1555 = vmatpush1.msk.msra.mxu1 %vm202_vm0, %v1658_v3  ;;  %944 = vmatprep.mubr.f32.mxu1 %v1614_v0 }
  0x22   : > { %1553 = vmatmul.mubr.msk.f32.vlgmr.msra.gmra.mxu0 %vm198_vm1, %v179_v20  ;;  %1556 = vmatmul.mubr.msk.f32.vlgmr.msra.gmra.mxu1 %vm198_vm1, %v179_v20 }
  0x23   : > { %1557 = vmatprep.subr.msk.mxu0 %vm202_vm0, %v1683_v10  ;;  %1560 = vmatprep.subr.msk.mxu1 %vm202_vm0, %v1693_v12 }
  0x24   : > { %1558 = vmatpush1.msk.msra.mxu0 %vm202_vm0, %v1660_v4  ;;  %1015 = vmatprep.mubr.f32.mxu0 %v1614_v0 }
  0x25   : > { %1561 = vmatpush1.msk.msra.mxu1 %vm202_vm0, %v1679_v9  ;;  %1086 = vmatprep.mubr.f32.mxu1 %v1614_v0 }
  0x26   : > { %1559 = vmatmul.mubr.msk.f32.vlgmr.msra.gmra.mxu0 %vm198_vm1, %v179_v20  ;;  %1562 = vmatmul.mubr.msk.f32.vlgmr.msra.gmra.mxu1 %vm198_vm1, %v179_v20 }
  0x27   : > { %1563 = vmatprep.subr.msk.mxu0 %vm202_vm0, %v1707_v14  ;;  %1566 = vmatprep.subr.msk.mxu1 %vm202_vm0, %v1717_v16 }
  0x28   : > { %1564 = vmatpush1.msk.msra.mxu0 %vm202_vm0, %v1685_v11  ;;  %1157 = vmatprep.mubr.f32.mxu0 %v1614_v0 }
  0x29   : > { %1567 = vmatpush1.msk.msra.mxu1 %vm202_vm0, %v1697_v13  ;;  %1228 = vmatprep.mubr.f32.mxu1 %v1614_v0 }
  0x2a   : > { %1565 = vmatmul.mubr.msk.f32.vlgmr.msra.gmra.mxu0 %vm198_vm1, %v179_v20  ;;  %1568 = vmatmul.mubr.msk.f32.vlgmr.msra.gmra.mxu1 %vm198_vm1, %v179_v20 }
  0x2b   : > { %1569 = vmatprep.subr.msk.mxu0 %vm202_vm0, %v1731_v18  ;;  %1572 = vmatprep.subr.msk.mxu1 %vm202_vm0, %v1739_v19 }
  0x2c   : > { %1570 = vmatpush1.msk.msra.mxu0 %vm202_vm0, %v1710_v15  ;;  %1299 = vmatprep.mubr.f32.mxu0 %v1614_v0 }
  0x2d   : > { %1573 = vmatpush1.msk.msra.mxu1 %vm202_vm0, %v1721_v17  ;;  %1370 = vmatprep.mubr.f32.mxu1 %v1614_v0 }
  0x2e   : > { %1571 = vmatmul.mubr.msk.f32.vlgmr.msra.gmra.mxu0 %vm198_vm1, %v179_v20  ;;  %1574 = vmatmul.mubr.msk.f32.vlgmr.msra.gmra.mxu1 %vm198_vm1, %v179_v20 }
  0x89   : > { %v1807_v37 = vpop.permute.xlu0 %1380 }
  0xd2   : > { %v302_v21 = vpop.f32.mrf.mxu0  ;;  %v373_v22 = vpop.f32.mrf.mxu1 }
  0xd4   : > { %v304_v23 = vpop.f32.mrf.mxu0  ;;  %v375_v24 = vpop.f32.mrf.mxu1 }
  0xd6   : > { %v444_v25 = vpop.f32.mrf.mxu0  ;;  %v515_v26 = vpop.f32.mrf.mxu1 }
  0xd8   : > { %v446_v27 = vpop.f32.mrf.mxu0  ;;  %v517_v28 = vpop.f32.mrf.mxu1 }
  0xda   : > { %v586_v29 = vpop.f32.mrf.mxu0  ;;  %v657_v30 = vpop.f32.mrf.mxu1 }
  0xdc   : > { %v588_v31 = vpop.f32.mrf.mxu0  ;;  %v659_v32 = vpop.f32.mrf.mxu1 }
  0xde   : > { %v728_v33 = vpop.f32.mrf.mxu0  ;;  %v799_v34 = vpop.f32.mrf.mxu1 }
  0xe0   : > { %v1805_v35 = vpop.f32.mrf.mxu0  ;;  %v1585_v36 = vpop.f32.mrf.mxu1 }
  0xe2   : > { %v875_v38 = vpop.f32.mrf.mxu0  ;;  %v946_v39 = vpop.f32.mrf.mxu1 }
  0xe3   : > { %v876_v40 = vadd.f32 %v875_v38, %v302_v21  ;;  %v947_v41 = vadd.f32 %v946_v39, %v373_v22 }
  0xe4   : > { %v877_v42 = vpop.f32.mrf.mxu0  ;;  %v948_v43 = vpop.f32.mrf.mxu1 }
  0xe5   : > { %v878_v44 = vadd.f32 %v877_v42, %v304_v23  ;;  %v1383_v45 = vadd.f32 %v1807_v37, %v876_v40  ;;  %v949_v46 = vadd.f32 %v948_v43, %v375_v24  ;;  %v1385_v47 = vadd.f32 %v1807_v37, %v947_v41 }
  0xe6   : > { %v1017_v48 = vpop.f32.mrf.mxu0  ;;  %v1088_v49 = vpop.f32.mrf.mxu1 }
  0xe7   : > { %v1384_v50 = vadd.f32 %v1807_v37, %v878_v44  ;;  %v1386_v51 = vadd.f32 %v1807_v37, %v949_v46  ;;  %v1407_v52 = vadd.f32 %v1383_v45, %v1662_v5  ;;  %v1409_v53 = vadd.f32 %v1385_v47, %v1658_v3 }
  0xe8   : > { %v1018_v54 = vadd.f32 %v1017_v48, %v444_v25  ;;  %v1089_v55 = vadd.f32 %v1088_v49, %v515_v26  ;;  %v1019_v56 = vpop.f32.mrf.mxu0  ;;  %v1090_v57 = vpop.f32.mrf.mxu1 }
  0xe9   : > { %v1408_v58 = vadd.f32 %v1384_v50, %v1670_v6  ;;  %v1410_v59 = vadd.f32 %v1386_v51, %v1674_v7  ;;  %v1020_v60 = vadd.f32 %v1019_v56, %v446_v27  ;;  %v1091_v61 = vadd.f32 %v1090_v57, %v517_v28 }
  0xea   : > { %v1387_v62 = vadd.f32 %v1807_v37, %v1018_v54  ;;  %v1389_v63 = vadd.f32 %v1807_v37, %v1089_v55  ;;  %v1159_v0 = vpop.f32.mrf.mxu0  ;;  %v1230_v1 = vpop.f32.mrf.mxu1 }
  0xeb   : > { %v1439_v2 = vcombine.low %v1407_v52, %v1408_v58  ;;  %v1440_v3 = vcombine.low %v1409_v53, %v1410_v59  ;;  %v1388_v5 = vadd.f32 %v1807_v37, %v1020_v60  ;;  %v1390_v6 = vadd.f32 %v1807_v37, %v1091_v61 }
  0xec   : > { %v1411_v7 = vadd.f32 %v1387_v62, %v1660_v4  ;;  %v1413_v8 = vadd.f32 %v1389_v63, %v1679_v9  ;;  %v1160_v20 = vadd.f32 %v1159_v0, %v586_v29  ;;  %v1231_v21 = vadd.f32 %v1230_v1, %v657_v30  ;;  %v1161_v22 = vpop.f32.mrf.mxu0  ;;  %v1232_v23 = vpop.f32.mrf.mxu1 }
  0xed   : > { %1455 = vst [vmem:[%s1822_s26] sm:$0xff] %v1439_v2  ;;  %1456 = vst [vmem:[%s1822_s26 + $0x8] sm:$0xff] %v1440_v3  ;;  %v1412_v24 = vadd.f32 %v1388_v5, %v1683_v10  ;;  %v1414_v25 = vadd.f32 %v1390_v6, %v1693_v12  ;;  %v1162_v26 = vadd.f32 %v1161_v22, %v588_v31 }
  0xee   : > { %v1233_v27 = vadd.f32 %v1232_v23, %v659_v32  ;;  %v1391_v28 = vadd.f32 %v1807_v37, %v1160_v20  ;;  %v1393_v4 = vadd.f32 %v1807_v37, %v1231_v21  ;;  %v1301_v36 = vpop.f32.mrf.mxu0  ;;  %v1372_v9 = vpop.f32.mrf.mxu1 }
  0xef   : > { %v1441_v29 = vcombine.low %v1411_v7, %v1412_v24  ;;  %v1442_v30 = vcombine.low %v1413_v8, %v1414_v25  ;;  %v1392_v38 = vadd.f32 %v1807_v37, %v1162_v26  ;;  %v1302_v31 = vadd.f32 %v1301_v36, %v728_v33 }
  0xf0   : > { %v1394_v39 = vadd.f32 %v1807_v37, %v1233_v27  ;;  %v1415_v10 = vadd.f32 %v1391_v28, %v1685_v11  ;;  %v1417_v12 = vadd.f32 %v1393_v4, %v1697_v13  ;;  %v1373_v40 = vadd.f32 %v1372_v9, %v799_v34  ;;  %v1303_v32 = vpop.f32.mrf.mxu0  ;;  %v1374_v41 = vpop.f32.mrf.mxu1 }
  0xf1   : > { %1457 = vst [vmem:[%s1822_s26 + $0x10] sm:$0xff] %v1441_v29  ;;  %1458 = vst [vmem:[%s1822_s26 + $0x18] sm:$0xff] %v1442_v30  ;;  %v1416_v42 = vadd.f32 %v1392_v38, %v1707_v14  ;;  %v1304_v44 = vadd.f32 %v1303_v32, %v1805_v35  ;;  %v1398_v11 = vadd.f32 %v1807_v37, %v1374_v41 }
  0xf2   : > { %v1418_v43 = vadd.f32 %v1394_v39, %v1717_v16  ;;  %v1395_v13 = vadd.f32 %v1807_v37, %v1302_v31  ;;  %v1397_v33 = vadd.f32 %v1807_v37, %v1373_v40 }
  0xf3   : > { %v1443_v34 = vcombine.low %v1415_v10, %v1416_v42  ;;  %v1396_v46 = vadd.f32 %v1807_v37, %v1304_v44  ;;  %v1422_v47 = vadd.f32 %v1398_v11, %v1739_v19 }
  0xf4   : > { %v1444_v45 = vcombine.low %v1417_v12, %v1418_v43  ;;  %v1421_v14 = vadd.f32 %v1397_v33, %v1721_v17  ;;  %v1419_v16 = vadd.f32 %v1395_v13, %v1710_v15 }
  0xf5   : > { %1459 = vst [vmem:[%s1822_s26 + $0x20] sm:$0xff] %v1443_v34  ;;  %v1420_v35 = vadd.f32 %v1396_v46, %v1731_v18 }
  0xf6   : > { %1460 = vst [vmem:[%s1822_s26 + $0x28] sm:$0xff] %v1444_v45  ;;  %v1446_v48 = vcombine.low %v1421_v14, %v1422_v47 }
  0xf7   : > { %v1445_v49 = vcombine.low %v1419_v16, %v1420_v35 }
  0xf8   : > { %1462 = vst [vmem:[%s1822_s26 + $0x38] sm:$0xff] %v1446_v48 }
  0xf9   : > { %1461 = vst [vmem:[%s1822_s26 + $0x30] sm:$0xff] %v1445_v49 }
  0xfa PF: > { %s13_s12 = sadd.s32 1, %s1612_s12  }
  0xfb   : > { %p10_p4 = scmp.ge.s32.totalorder %s13_s12, 4  }
  0xfd   :  { %12 = sbr.rel (!%p10_p4) target bundleno = 1 (0x1), region = 63 }

</bundles_post_ra>
